<compile_context>
chip_gen: v5e
topology: v5e:2x2
jax: 0.10.0
libtpu: 0.0.40
codegen_flags: <defaults>
</compile_context>

<pallas_src>
import jax
import jax.numpy as jnp
from jax.experimental import pallas as pl
from jax.experimental.pallas import tpu as pltpu

_LANE = 128
_SUBLANE = 8


def _round_up(x, m):
    return ((x + m - 1) // m) * m


def _vmem_capacity_bytes():
    """Physical per-core VMEM; conservative 64 MiB (v7x) fallback."""
    try:
        info = pltpu.get_tpu_info()
        cap = getattr(info, "vmem_capacity_bytes", None)
        if cap:
            return int(cap)
    except Exception:
        pass
    return 64 * 1024 * 1024


def _mlp_kernel(x_ref,
                w1_ref, b1_ref,
                w2_ref, b2_ref,
                w3_ref, b3_ref,
                w4_ref, b4_ref,
                o_ref):
    cdt = w1_ref.dtype          # bf16 on the fast path, f32 on the exact path

    def dot(a, w_ref):
        a = a.astype(cdt)
        if cdt == jnp.float32:
            # Pin the f32 multi-pass MXU behaviour explicitly.
            return jnp.dot(a, w_ref[...], preferred_element_type=jnp.float32,
                           precision=jax.lax.Precision.HIGHEST)
        return jnp.dot(a, w_ref[...], preferred_element_type=jnp.float32)

    # Bias add + ReLU stay in f32; matmul operands are cast to `cdt`.
    h = jnp.maximum(dot(x_ref[...], w1_ref) + b1_ref[...], 0.0)   # [TB,128]
    h = jnp.maximum(dot(h, w2_ref) + b2_ref[...], 0.0)            # [TB,128]
    h = jnp.maximum(dot(h, w3_ref) + b3_ref[...], 0.0)            # [TB,128]
    h = jnp.maximum(dot(h, w4_ref) + b4_ref[...], 0.0)            # [TB,128]
    o_ref[...] = h.astype(o_ref.dtype)


def forward_ann(x, params, *, matmul_dtype=jnp.bfloat16, max_tile_b=2048):
    """x: [B, C, H, W] (NCHW, same as the PyTorch module), f32 or bf16.
       params: dict of (w, b) per layer, w as (in_features, out_features),
       b as (1, out_features), f32."""
    b = x.shape[0]
    x2d = x.reshape(b, -1)                      # torch.flatten(x, 1)
    num_ins = x2d.shape[1]

    w1, b1 = params["l1"]
    w2, b2 = params["l2"]
    w3, b3 = params["l3"]
    w4, b4 = params["l4"]
    num_outs = w4.shape[1]

    h1 = h2 = h3 = _LANE                        # 80 / 55 / 25 -> 128 lanes
    n_pad = _round_up(num_outs, _LANE)

    def padw(w, rows, cols):
        return jnp.pad(w, ((0, rows - w.shape[0]),
                           (0, cols - w.shape[1]))).astype(matmul_dtype)

    def padb(bv, cols):
        return jnp.pad(bv, ((0, 0), (0, cols - bv.shape[1]))).astype(jnp.float32)

    w1p, b1p = padw(w1, num_ins, h1), padb(b1, h1)
    w2p, b2p = padw(w2, h1, h2),      padb(b2, h2)
    w3p, b3p = padw(w3, h2, h3),      padb(b3, h3)
    w4p, b4p = padw(w4, h3, n_pad),   padb(b4, n_pad)

    # ---- generation-aware batch tile (x double-buffer must fit VMEM) ----
    x_item = jnp.dtype(x2d.dtype).itemsize
    w_item = jnp.dtype(matmul_dtype).itemsize
    cap = _vmem_capacity_bytes()
    budget = int(cap * 0.6)                     # headroom for compiler scratch
    weight_vmem = (2 * w_item * (num_ins * h1 + h1 * h2 + h2 * h3 + h3 * n_pad)
                   + 2 * 4 * (h1 + h2 + h3 + n_pad))
    row_vmem = 2 * num_ins * x_item + 2 * n_pad * 4   # dbl-buffered x + out tile
    tile = (budget - weight_vmem) // row_vmem
    tile = max(_SUBLANE, min(max_tile_b, (tile // _SUBLANE) * _SUBLANE))
    # >=2 grid steps whenever possible so "parallel" uses both v7x TCs.
    tile = min(tile, max(_SUBLANE, _round_up(-(-b // 2), _SUBLANE)))
    grid = (pl.cdiv(b, tile),)                  # ragged last block, no jnp.pad

    const = lambda i: (0, 0)                    # weights/biases VMEM-resident

    flops = 2 * b * (num_ins * h1 + h1 * h2 + h2 * h3 + h3 * n_pad)
    bytes_accessed = (x_item * b * num_ins + 4 * b * n_pad
                      + w_item * (num_ins * h1 + h1 * h2 + h2 * h3 + h3 * n_pad)
                      + 4 * (h1 + h2 + h3 + n_pad))

    out = pl.pallas_call(
        _mlp_kernel,
        out_shape=jax.ShapeDtypeStruct((b, n_pad), jnp.float32),
        grid=grid,
        in_specs=[
            pl.BlockSpec((tile, num_ins), lambda i: (i, 0)),   # pipelined x tile
            pl.BlockSpec((num_ins, h1), const), pl.BlockSpec((1, h1), const),
            pl.BlockSpec((h1, h2), const),      pl.BlockSpec((1, h2), const),
            pl.BlockSpec((h2, h3), const),      pl.BlockSpec((1, h3), const),
            pl.BlockSpec((h3, n_pad), const),   pl.BlockSpec((1, n_pad), const),
        ],
        out_specs=pl.BlockSpec((tile, n_pad), lambda i: (i, 0)),
        compiler_params=pltpu.CompilerParams(
            dimension_semantics=("parallel",),
            vmem_limit_bytes=int(cap * 0.75),
        ),
        cost_estimate=pl.CostEstimate(
            flops=flops, transcendentals=0, bytes_accessed=int(bytes_accessed)),
    )(x2d, w1p, b1p, w2p, b2p, w3p, b3p, w4p, b4p)

    # Rows are already exactly B (ragged edge handled in-kernel); only the
    # lane-padded columns are sliced off.  Consumers that tolerate a 128-lane
    # padded result may skip this slice to save one XLA pass.
    return out[:, :num_outs]


def init_params(key, num_ins, num_outs):
    """Deterministic init mimicking nn.Linear's U(-1/sqrt(fan_in), 1/sqrt(fan_in)).
       Weights stored as (in_features, out_features); biases as (1, out_features)."""
    dims = [(num_ins, 80), (80, 55), (55, 25), (25, num_outs)]
    params = {}
    for i, (fan_in, fan_out) in enumerate(dims, start=1):
        key, kw, kb = jax.random.split(key, 3)
        bound = 1.0 / jnp.sqrt(float(fan_in))
        w = jax.random.uniform(kw, (fan_in, fan_out), jnp.float32, -bound, bound)
        bvec = jax.random.uniform(kb, (1, fan_out), jnp.float32, -bound, bound)
        params[f"l{i}"] = (w, bvec)
    return params


def _reference(x, params):
    """Pure-f32 reference matching the PyTorch module semantics."""
    h = x.reshape(x.shape[0], -1).astype(jnp.float32)
    for name in ("l1", "l2", "l3", "l4"):
        w, bvec = params[name]
        h = jnp.maximum(h @ w + bvec, 0.0)
    return h


if __name__ == "__main__":
    key = jax.random.PRNGKey(0)
    key, kx = jax.random.split(key)

    B, C, H, W = 2, 4, 16, 16            # flattened -> numIns = 1024
    NUM_INS = C * H * W
    NUM_OUTS = 10

    x = jax.random.normal(kx, (B, C, H, W), jnp.float32)
    params = init_params(key, NUM_INS, NUM_OUTS)

    y = jax.block_until_ready(forward_ann(x, params))
    y_ref = _reference(x, params)

    assert y.shape == (B, NUM_OUTS)
    # bf16 matmul operands / f32 accumulation vs. the pure-f32 reference.
    assert jnp.allclose(y, y_ref, atol=2e-2, rtol=2e-2), \
        float(jnp.max(jnp.abs(y - y_ref)))

    print("KERNEL_OK")
</pallas_src>

<mosaic_0001>
module attributes {stable_mosaic.version = 11 : i64} {
  func.func @_mlp_kernel(%arg0: i32, %arg1: memref<8x1024xf32, #tpu.memory_space<vmem>>, %arg2: memref<1024x128xbf16, #tpu.memory_space<vmem>>, %arg3: memref<1x128xf32, #tpu.memory_space<vmem>>, %arg4: memref<128x128xbf16, #tpu.memory_space<vmem>>, %arg5: memref<1x128xf32, #tpu.memory_space<vmem>>, %arg6: memref<128x128xbf16, #tpu.memory_space<vmem>>, %arg7: memref<1x128xf32, #tpu.memory_space<vmem>>, %arg8: memref<128x128xbf16, #tpu.memory_space<vmem>>, %arg9: memref<1x128xf32, #tpu.memory_space<vmem>>, %arg10: memref<8x128xf32, #tpu.memory_space<vmem>>) attributes {dimension_semantics = [#tpu.dimension_semantics<parallel>], iteration_bounds = array<i64: 1>, scalar_prefetch = 0 : i64, scratch_operands = 0 : i64, tpu.core_type = #tpu.core_type<tc>, window_params = [{transform_indices = @transform_0, window_bounds = array<i64: 8, 1024>}, {pipeline_mode = #tpu.pipeline_mode<synchronous>, transform_indices = @transform_1, window_bounds = array<i64: 1024, 128>}, {pipeline_mode = #tpu.pipeline_mode<synchronous>, transform_indices = @transform_2, window_bounds = array<i64: 1, 128>}, {pipeline_mode = #tpu.pipeline_mode<synchronous>, transform_indices = @transform_3, window_bounds = array<i64: 128, 128>}, {pipeline_mode = #tpu.pipeline_mode<synchronous>, transform_indices = @transform_4, window_bounds = array<i64: 1, 128>}, {pipeline_mode = #tpu.pipeline_mode<synchronous>, transform_indices = @transform_5, window_bounds = array<i64: 128, 128>}, {pipeline_mode = #tpu.pipeline_mode<synchronous>, transform_indices = @transform_6, window_bounds = array<i64: 1, 128>}, {pipeline_mode = #tpu.pipeline_mode<synchronous>, transform_indices = @transform_7, window_bounds = array<i64: 128, 128>}, {pipeline_mode = #tpu.pipeline_mode<synchronous>, transform_indices = @transform_8, window_bounds = array<i64: 1, 128>}, {transform_indices = @transform_9, window_bounds = array<i64: 8, 128>}]} {
    %c0 = arith.constant 0 : index
    %c0_0 = arith.constant 0 : index
    %0 = vector.load %arg1[%c0, %c0_0] : memref<8x1024xf32, #tpu.memory_space<vmem>>, vector<8x1024xf32>
    %1 = arith.truncf %0 : vector<8x1024xf32> to vector<8x1024xbf16>
    %c0_1 = arith.constant 0 : index
    %c0_2 = arith.constant 0 : index
    %2 = vector.load %arg2[%c0_1, %c0_2] : memref<1024x128xbf16, #tpu.memory_space<vmem>>, vector<1024x128xbf16>
    %cst = arith.constant dense<0.000000e+00> : vector<8x128xf32>
    %3 = tpu.matmul %1, %2, %cst {dimension_numbers = #tpu.dot_dimension_numbers<[1], [0], [0], [1], [0, 0, 1, 1], [], []>} : vector<8x1024xbf16>, vector<1024x128xbf16>, vector<8x128xf32> -> vector<8x128xf32>
    %c0_3 = arith.constant 0 : index
    %c0_4 = arith.constant 0 : index
    %4 = vector.load %arg3[%c0_3, %c0_4] : memref<1x128xf32, #tpu.memory_space<vmem>>, vector<1x128xf32>
    %5 = vector.broadcast %4 : vector<1x128xf32> to vector<8x128xf32>
    %6 = arith.addf %3, %5 : vector<8x128xf32>
    %cst_5 = arith.constant 0.000000e+00 : f32
    %7 = vector.broadcast %cst_5 : f32 to vector<8x128xf32>
    %8 = arith.maximumf %6, %7 : vector<8x128xf32>
    %9 = arith.truncf %8 : vector<8x128xf32> to vector<8x128xbf16>
    %c0_6 = arith.constant 0 : index
    %c0_7 = arith.constant 0 : index
    %10 = vector.load %arg4[%c0_6, %c0_7] : memref<128x128xbf16, #tpu.memory_space<vmem>>, vector<128x128xbf16>
    %cst_8 = arith.constant dense<0.000000e+00> : vector<8x128xf32>
    %11 = tpu.matmul %9, %10, %cst_8 {dimension_numbers = #tpu.dot_dimension_numbers<[1], [0], [0], [1], [0, 0, 1, 1], [], []>} : vector<8x128xbf16>, vector<128x128xbf16>, vector<8x128xf32> -> vector<8x128xf32>
    %c0_9 = arith.constant 0 : index
    %c0_10 = arith.constant 0 : index
    %12 = vector.load %arg5[%c0_9, %c0_10] : memref<1x128xf32, #tpu.memory_space<vmem>>, vector<1x128xf32>
    %13 = vector.broadcast %12 : vector<1x128xf32> to vector<8x128xf32>
    %14 = arith.addf %11, %13 : vector<8x128xf32>
    %cst_11 = arith.constant 0.000000e+00 : f32
    %15 = vector.broadcast %cst_11 : f32 to vector<8x128xf32>
    %16 = arith.maximumf %14, %15 : vector<8x128xf32>
    %17 = arith.truncf %16 : vector<8x128xf32> to vector<8x128xbf16>
    %c0_12 = arith.constant 0 : index
    %c0_13 = arith.constant 0 : index
    %18 = vector.load %arg6[%c0_12, %c0_13] : memref<128x128xbf16, #tpu.memory_space<vmem>>, vector<128x128xbf16>
    %cst_14 = arith.constant dense<0.000000e+00> : vector<8x128xf32>
    %19 = tpu.matmul %17, %18, %cst_14 {dimension_numbers = #tpu.dot_dimension_numbers<[1], [0], [0], [1], [0, 0, 1, 1], [], []>} : vector<8x128xbf16>, vector<128x128xbf16>, vector<8x128xf32> -> vector<8x128xf32>
    %c0_15 = arith.constant 0 : index
    %c0_16 = arith.constant 0 : index
    %20 = vector.load %arg7[%c0_15, %c0_16] : memref<1x128xf32, #tpu.memory_space<vmem>>, vector<1x128xf32>
    %21 = vector.broadcast %20 : vector<1x128xf32> to vector<8x128xf32>
    %22 = arith.addf %19, %21 : vector<8x128xf32>
    %cst_17 = arith.constant 0.000000e+00 : f32
    %23 = vector.broadcast %cst_17 : f32 to vector<8x128xf32>
    %24 = arith.maximumf %22, %23 : vector<8x128xf32>
    %25 = arith.truncf %24 : vector<8x128xf32> to vector<8x128xbf16>
    %c0_18 = arith.constant 0 : index
    %c0_19 = arith.constant 0 : index
    %26 = vector.load %arg8[%c0_18, %c0_19] : memref<128x128xbf16, #tpu.memory_space<vmem>>, vector<128x128xbf16>
    %cst_20 = arith.constant dense<0.000000e+00> : vector<8x128xf32>
    %27 = tpu.matmul %25, %26, %cst_20 {dimension_numbers = #tpu.dot_dimension_numbers<[1], [0], [0], [1], [0, 0, 1, 1], [], []>} : vector<8x128xbf16>, vector<128x128xbf16>, vector<8x128xf32> -> vector<8x128xf32>
    %c0_21 = arith.constant 0 : index
    %c0_22 = arith.constant 0 : index
    %28 = vector.load %arg9[%c0_21, %c0_22] : memref<1x128xf32, #tpu.memory_space<vmem>>, vector<1x128xf32>
    %29 = vector.broadcast %28 : vector<1x128xf32> to vector<8x128xf32>
    %30 = arith.addf %27, %29 : vector<8x128xf32>
    %cst_23 = arith.constant 0.000000e+00 : f32
    %31 = vector.broadcast %cst_23 : f32 to vector<8x128xf32>
    %32 = arith.maximumf %30, %31 : vector<8x128xf32>
    %c0_24 = arith.constant 0 : index
    %c0_25 = arith.constant 0 : index
    %33 = vector.load %arg10[%c0_24, %c0_25] : memref<8x128xf32, #tpu.memory_space<vmem>>, vector<8x128xf32>
    tpu.vector_store %arg10[%c0_24, %c0_25], %32 {strides = array<i32>} : memref<8x128xf32, #tpu.memory_space<vmem>>, vector<8x128xf32>,
    return
  }
  func.func @transform_0(%arg0: i32) -> (i32, i32) {
    %c0_i32 = arith.constant 0 : i32
    %c0_i32_0 = arith.constant 0 : i32
    return %arg0, %c0_i32 : i32, i32
  }
  func.func @transform_1(%arg0: i32) -> (i32, i32) {
    %c0_i32 = arith.constant 0 : i32
    %c0_i32_0 = arith.constant 0 : i32
    %c0_i32_1 = arith.constant 0 : i32
    return %c0_i32, %c0_i32_0 : i32, i32
  }
  func.func @transform_2(%arg0: i32) -> (i32, i32) {
    %c0_i32 = arith.constant 0 : i32
    %c0_i32_0 = arith.constant 0 : i32
    %c0_i32_1 = arith.constant 0 : i32
    return %c0_i32, %c0_i32_0 : i32, i32
  }
  func.func @transform_3(%arg0: i32) -> (i32, i32) {
    %c0_i32 = arith.constant 0 : i32
    %c0_i32_0 = arith.constant 0 : i32
    %c0_i32_1 = arith.constant 0 : i32
    return %c0_i32, %c0_i32_0 : i32, i32
  }
  func.func @transform_4(%arg0: i32) -> (i32, i32) {
    %c0_i32 = arith.constant 0 : i32
    %c0_i32_0 = arith.constant 0 : i32
    %c0_i32_1 = arith.constant 0 : i32
    return %c0_i32, %c0_i32_0 : i32, i32
  }
  func.func @transform_5(%arg0: i32) -> (i32, i32) {
    %c0_i32 = arith.constant 0 : i32
    %c0_i32_0 = arith.constant 0 : i32
    %c0_i32_1 = arith.constant 0 : i32
    return %c0_i32, %c0_i32_0 : i32, i32
  }
  func.func @transform_6(%arg0: i32) -> (i32, i32) {
    %c0_i32 = arith.constant 0 : i32
    %c0_i32_0 = arith.constant 0 : i32
    %c0_i32_1 = arith.constant 0 : i32
    return %c0_i32, %c0_i32_0 : i32, i32
  }
  func.func @transform_7(%arg0: i32) -> (i32, i32) {
    %c0_i32 = arith.constant 0 : i32
    %c0_i32_0 = arith.constant 0 : i32
    %c0_i32_1 = arith.constant 0 : i32
    return %c0_i32, %c0_i32_0 : i32, i32
  }
  func.func @transform_8(%arg0: i32) -> (i32, i32) {
    %c0_i32 = arith.constant 0 : i32
    %c0_i32_0 = arith.constant 0 : i32
    %c0_i32_1 = arith.constant 0 : i32
    return %c0_i32, %c0_i32_0 : i32, i32
  }
  func.func @transform_9(%arg0: i32) -> (i32, i32) {
    %c0_i32 = arith.constant 0 : i32
    %c0_i32_0 = arith.constant 0 : i32
    return %arg0, %c0_i32 : i32, i32
  }
}

</mosaic_0001>

<bundles_post_ra>
// kernel: tpu_custom_call.1
= control target key start
LH: loop header
LB: loop body
LE: loop exit
PB: predicated region body
PF: predicated region fallthrough
CT: control target
= control target key end

     0   :  { %14 = vsyncpa [#allocation3], 0  ;;  %s1770_s0 = inlined_call_operand.hbm [shape: f32[2,1024], index: 0, kind: input, shape index: {}]   ;;  %s1771_s1 = inlined_call_operand.hbm [shape: bf16[1024,128], index: 1, kind: input, shape index: {}]   ;;  %s1772_s2 = inlined_call_operand.vmem [shape: f32[1,128], index: 2, kind: input, shape index: {}]   ;;  %s1773_s3 = inlined_call_operand.hbm [shape: bf16[128,128], index: 3, kind: input, shape index: {}]   ;;  %s1774_s4 = inlined_call_operand.vmem [shape: f32[1,128], index: 4, kind: input, shape index: {}]   ;;  %s1775_s5 = inlined_call_operand.hbm [shape: bf16[128,128], index: 5, kind: input, shape index: {}]   ;;  %s1776_s6 = inlined_call_operand.vmem [shape: f32[1,128], index: 6, kind: input, shape index: {}]   ;;  %s1777_s7 = inlined_call_operand.hbm [shape: bf16[128,128], index: 7, kind: input, shape index: {}]   ;;  %s1778_s8 = inlined_call_operand.vmem [shape: f32[1,128], index: 8, kind: input, shape index: {}]   ;;  %s1779_s9 = inlined_call_operand.hbm [shape: f32[2,128], index: 9, kind: output, shape index: {}]  }
   0x1   :  { %15 = vsyncpa [#allocation6], 0 }
   0x2   :  { %16 = vsyncpa [#allocation9], 0 }
   0x3   :  { %17 = vsyncpa [#allocation4], 0  ;;  %s35_s11 = sshll.u32 %s1771_s1, 4  ;;  %s36_s11 = int_to_ptr.hbm [resolvable:$true] %s35_s11 }
   0x4   :  { %21 = vsyncadd [#allocation3], 768  ;;  %s1666_s12 = smov [#allocation5]   ;;  %s65_s16 = sshll.u32 %s1775_s5, 4  ;;  %s66_s16 = int_to_ptr.hbm [resolvable:$true] %s65_s16 }
   0x5   :  { %s37_s13 = sshll.u32 %s1666_s12, 4  ;;  %s1667_s17 = smov 64   ;;  %s38_s13 = int_to_ptr.vmem [resolvable:$true] %s37_s13 }
   0x6   :  { %s1668_s18 = smov 4   ;;  %s1669_s19 = smov [#allocation8]  }
   0x7   :  { %43 = dma.hbm_to_vmem [thread:$0]  %s36_s11, 8192, %s38_s13, [#allocation6], %s1667_s17, %s1667_s17, %s1668_s18  }
   0x8   :  { %s67_s20 = sshll.u32 %s1669_s19, 4  ;;  %s22_s22 = sshll.u32 %s1770_s0, 4  ;;  %s68_s20 = int_to_ptr.vmem [resolvable:$true] %s67_s20  ;;  %s23_s22 = int_to_ptr.hbm [resolvable:$true] %s22_s22 }
   0x9   :  { %73 = dma.hbm_to_vmem [thread:$0]  %s66_s16, 1024, %s68_s20, [#allocation9], %s1667_s17, %s1667_s17, %s1668_s18  }
   0xa   :  { %s1670_s5 = smov [#allocation2]   ;;  %s50_s26 = sshll.u32 %s1773_s3, 4  ;;  %s51_s26 = int_to_ptr.hbm [resolvable:$true] %s50_s26 }
   0xb   :  { %s24_s23 = sshll.u32 %s1670_s5, 4  ;;  %s1671_s27 = smov 256   ;;  %s25_s23 = int_to_ptr.vmem [resolvable:$true] %s24_s23 }
   0xc   :  { %s1672_s28 = smov 16   ;;  %s1673_s29 = smov [#allocation7]  }
   0xd   :  { %30 = dma.hbm_to_vmem [thread:$0]  %s23_s22, 256, %s25_s23, [#allocation3], %s1671_s27, %s1671_s27, %s1672_s28  }
   0xe   :  { %s52_s30 = sshll.u32 %s1673_s29, 4  ;;  %s80_s11 = sshll.u32 %s1777_s7, 4  ;;  %s53_s30 = int_to_ptr.vmem [resolvable:$true] %s52_s30  ;;  %s81_s11 = int_to_ptr.hbm [resolvable:$true] %s80_s11 }
   0xf   :  { %58 = dma.hbm_to_vmem [thread:$0]  %s51_s26, 1024, %s53_s30, [#allocation6], %s1667_s17, %s1667_s17, %s1668_s18  }
  0x10   :  { %s1674_s12 = smov [#allocation10]  }
  0x11   :  { %s82_s13 = sshll.u32 %s1674_s12, 4  ;;  %s83_s13 = int_to_ptr.vmem [resolvable:$true] %s82_s13 }
  0x12   :  { %88 = dma.hbm_to_vmem [thread:$0]  %s81_s11, 1024, %s83_s13, [#allocation9], %s1667_s17, %s1667_s17, %s1668_s18  }
  0x13   :  { %1658 = dma.done.wait [#allocation3], 1024  }
  0x14   :  { %1659 = vsyncadd [#allocation3], 4294966272 }
  0x15   :  { %1660 = dma.done.wait [#allocation6], 9216  }
  0x16   :  { %1661 = vsyncadd [#allocation6], 4294958080 }
  0x17   :  { %1662 = dma.done.wait [#allocation9], 2048  }
  0x18   :  { %1663 = vsyncadd [#allocation9], 4294965248  ;;  %v1417_v0 = vld [vmem:[#allocation5 + $0x38] sm:$0xff]  ;;  %v1416_v4 = vld [vmem:[#allocation5 + $0x30] sm:$0xff] }
  0x19   :  { %v1425_v1 = vld [vmem:[#allocation5 + $0x78] sm:$0xff]  ;;  %682 = vmatpush.bf16.msra.mxu0 %v1417_v0  ;;  %v1424_v5 = vld [vmem:[#allocation5 + $0x70] sm:$0xff]  ;;  %v1415_v8 = vld [vmem:[#allocation5 + $0x28] sm:$0xff] }
  0x1a   :  { %v1433_v2 = vld [vmem:[#allocation5 + $0xb8] sm:$0xff]  ;;  %695 = vmatpush.bf16.msra.mxu1 %v1425_v1  ;;  %v1432_v6 = vld [vmem:[#allocation5 + $0xb0] sm:$0xff]  ;;  %v1423_v9 = vld [vmem:[#allocation5 + $0x68] sm:$0xff] }
  0x1b   :  { %v1441_v3 = vld [vmem:[#allocation5 + $0xf8] sm:$0xff]  ;;  %708 = vmatpush.bf16.msra.mxu2 %v1433_v2  ;;  %v1440_v7 = vld [vmem:[#allocation5 + $0xf0] sm:$0xff]  ;;  %v1431_v10 = vld [vmem:[#allocation5 + $0xa8] sm:$0xff] }
  0x1c   :  { %721 = vmatpush.bf16.msra.mxu3 %v1441_v3  ;;  %v1439_v11 = vld [vmem:[#allocation5 + $0xe8] sm:$0xff]  ;;  %v1414_v12 = vld [vmem:[#allocation5 + $0x20] sm:$0xff]  ;;  %v1413_v16 = vld [vmem:[#allocation5 + $0x18] sm:$0xff] }
  0x1d   :  { %683 = vmatpush.bf16.msra.mxu0 %v1416_v4  ;;  %v1422_v13 = vld [vmem:[#allocation5 + $0x60] sm:$0xff]  ;;  %v113_v18 = vld [vmem:[#allocation2 + $0x10] sm:$0xff]  ;;  %v1421_v19 = vld [vmem:[#allocation5 + $0x58] sm:$0xff] }
  0x1e   :  { %696 = vmatpush.bf16.msra.mxu1 %v1424_v5  ;;  %v1430_v14 = vld [vmem:[#allocation5 + $0xa0] sm:$0xff]  ;;  %v117_v21 = vld [vmem:[#allocation2 + $0x30] sm:$0xff]  ;;  %v1429_v22 = vld [vmem:[#allocation5 + $0x98] sm:$0xff]  ;;  %129 = vst [vmem:[#allocation1 + $0x1] ss:$4 sm:$0xff] %v113_v18 }
  0x1f   :  { %709 = vmatpush.bf16.msra.mxu2 %v1432_v6  ;;  %v1438_v15 = vld [vmem:[#allocation5 + $0xe0] sm:$0xff]  ;;  %v1437_v23 = vld [vmem:[#allocation5 + $0xd8] sm:$0xff]  ;;  %133 = vst [vmem:[#allocation1 + $0x3] ss:$4 sm:$0xff] %v117_v21  ;;  %v1412_v24 = vld [vmem:[#allocation5 + $0x10] sm:$0xff] }
  0x20   :  { %722 = vmatpush.bf16.msra.mxu3 %v1440_v7  ;;  %v111_v17 = vld [vmem:[#allocation2] sm:$0xff]  ;;  %v1420_v25 = vld [vmem:[#allocation5 + $0x50] sm:$0xff]  ;;  %v112_v28 = vld [vmem:[#allocation2 + $0x8] sm:$0xff] }
  0x21   :  { %684 = vmatpush.bf16.msra.mxu0 %v1415_v8  ;;  %v115_v20 = vld [vmem:[#allocation2 + $0x20] sm:$0xff]  ;;  %127 = vst [vmem:[#allocation1] ss:$4 sm:$0xff] %v111_v17  ;;  %v1428_v26 = vld [vmem:[#allocation5 + $0x90] sm:$0xff]  ;;  %v114_v29 = vld [vmem:[#allocation2 + $0x18] sm:$0xff] }
  0x22   :  { %697 = vmatpush.bf16.msra.mxu1 %v1423_v9  ;;  %131 = vst [vmem:[#allocation1 + $0x2] ss:$4 sm:$0xff] %v115_v20  ;;  %v1436_v27 = vld [vmem:[#allocation5 + $0xd0] sm:$0xff]  ;;  %v1411_v30 = vld [vmem:[#allocation5 + $0x8] sm:$0xff]  ;;  %v1410_v35 = vld [vmem:[#allocation5] sm:$0xff] }
  0x23   :  { %710 = vmatpush.bf16.msra.mxu2 %v1431_v10  ;;  %v1419_v31 = vld [vmem:[#allocation5 + $0x48] sm:$0xff]  ;;  %135 = vst [vmem:[#allocation1 + $0x20] ss:$4 sm:$0xff] %v112_v28  ;;  %v118_v36 = vld [vmem:[#allocation2 + $0x38] sm:$0xff]  ;;  %v1418_v37 = vld [vmem:[#allocation5 + $0x40] sm:$0xff] }
  0x24   :  { %723 = vmatpush.bf16.msra.mxu3 %v1439_v11  ;;  %v1427_v32 = vld [vmem:[#allocation5 + $0x88] sm:$0xff]  ;;  %137 = vst [vmem:[#allocation1 + $0x21] ss:$4 sm:$0xff] %v114_v29  ;;  %v1426_v38 = vld [vmem:[#allocation5 + $0x80] sm:$0xff]  ;;  %v1449_v40 = vld [vmem:[#allocation5 + $0x138] sm:$0xff] }
  0x25   :  { %685 = vmatpush.bf16.msra.mxu0 %v1414_v12  ;;  %v1435_v33 = vld [vmem:[#allocation5 + $0xc8] sm:$0xff]  ;;  %v1434_v39 = vld [vmem:[#allocation5 + $0xc0] sm:$0xff]  ;;  %v1457_v42 = vld [vmem:[#allocation5 + $0x178] sm:$0xff]  ;;  %141 = vst [vmem:[#allocation1 + $0x23] ss:$4 sm:$0xff] %v118_v36 }
  0x26   :  { %698 = vmatpush.bf16.msra.mxu1 %v1422_v13  ;;  %v116_v34 = vld [vmem:[#allocation2 + $0x28] sm:$0xff]  ;;  %v1465_v46 = vld [vmem:[#allocation5 + $0x1b8] sm:$0xff]  ;;  %v1448_v52 = vld [vmem:[#allocation5 + $0x130] sm:$0xff] }
  0x27   :  { %711 = vmatpush.bf16.msra.mxu2 %v1430_v14  ;;  %139 = vst [vmem:[#allocation1 + $0x22] ss:$4 sm:$0xff] %v116_v34  ;;  %v1473_v47 = vld [vmem:[#allocation5 + $0x1f8] sm:$0xff]  ;;  %v1456_v53 = vld [vmem:[#allocation5 + $0x170] sm:$0xff]  ;;  %v1447_v56 = vld [vmem:[#allocation5 + $0x128] sm:$0xff] }
  0x28   :  { %724 = vmatpush.bf16.msra.mxu3 %v1438_v15  ;;  %v1464_v54 = vld [vmem:[#allocation5 + $0x1b0] sm:$0xff]  ;;  %v1455_v57 = vld [vmem:[#allocation5 + $0x168] sm:$0xff]  ;;  %v1446_v60 = vld [vmem:[#allocation5 + $0x120] sm:$0xff] }
  0x29   :  { %686 = vmatpush.bf16.msra.mxu0 %v1413_v16  ;;  %v144_v41 = vld.sshfl [vmem:[#allocation1 + $0x10] sm:$0xff pattern:$0x73625140]  ;;  %v142_v43 = vld.sshfl [vmem:[#allocation1] sm:$0xff pattern:$0x73625140] }
  0x2a   :  { %699 = vmatpush.bf16.msra.mxu1 %v1421_v19  ;;  %v145_v44 = vld.sshfl [vmem:[#allocation1 + $0x18] sm:$0xff pattern:$0x73625140]  ;;  %v143_v45 = vld.sshfl [vmem:[#allocation1 + $0x8] sm:$0xff pattern:$0x73625140]  ;;  %v160_v48 = vpack.c.bf16 %v144_v41, %v144_v41  ;;  %v158_v49 = vpack.c.bf16 %v142_v43, %v142_v43 }
  0x2b   :  { %712 = vmatpush.bf16.msra.mxu2 %v1429_v22  ;;  %v161_v50 = vpack.c.bf16 %v145_v44, %v145_v44  ;;  %v159_v51 = vpack.c.bf16 %v143_v45, %v143_v45  ;;  %v1472_v55 = vld [vmem:[#allocation5 + $0x1f0] sm:$0xff]  ;;  %v1463_v58 = vld [vmem:[#allocation5 + $0x1a8] sm:$0xff]  ;;  %v1454_v61 = vld [vmem:[#allocation5 + $0x160] sm:$0xff] }
  0x2c   :  { %725 = vmatpush.bf16.msra.mxu3 %v1437_v23  ;;  %v1471_v59 = vld [vmem:[#allocation5 + $0x1e8] sm:$0xff]  ;;  %v1462_v62 = vld [vmem:[#allocation5 + $0x1a0] sm:$0xff]  ;;  %v1445_v0 = vld [vmem:[#allocation5 + $0x118] sm:$0xff] }
  0x2d   :  { %687 = vmatpush.bf16.msra.mxu0 %v1412_v24  ;;  %v1470_v63 = vld [vmem:[#allocation5 + $0x1e0] sm:$0xff]  ;;  %v1453_v1 = vld [vmem:[#allocation5 + $0x158] sm:$0xff]  ;;  %v1444_v4 = vld [vmem:[#allocation5 + $0x110] sm:$0xff] }
  0x2e   :  { %700 = vmatpush.bf16.msra.mxu1 %v1420_v25  ;;  %v1461_v2 = vld [vmem:[#allocation5 + $0x198] sm:$0xff]  ;;  %v1452_v5 = vld [vmem:[#allocation5 + $0x150] sm:$0xff]  ;;  %v1443_v8 = vld [vmem:[#allocation5 + $0x108] sm:$0xff] }
  0x2f   :  { %713 = vmatpush.bf16.msra.mxu2 %v1428_v26  ;;  %v1469_v3 = vld [vmem:[#allocation5 + $0x1d8] sm:$0xff]  ;;  %v1460_v6 = vld [vmem:[#allocation5 + $0x190] sm:$0xff]  ;;  %v1451_v9 = vld [vmem:[#allocation5 + $0x148] sm:$0xff] }
  0x30   :  { %726 = vmatpush.bf16.msra.mxu3 %v1436_v27  ;;  %v1468_v7 = vld [vmem:[#allocation5 + $0x1d0] sm:$0xff]  ;;  %v1459_v10 = vld [vmem:[#allocation5 + $0x188] sm:$0xff]  ;;  %v1442_v12 = vld [vmem:[#allocation5 + $0x100] sm:$0xff] }
  0x31   :  { %688 = vmatpush.bf16.msra.mxu0 %v1411_v30  ;;  %v1467_v11 = vld [vmem:[#allocation5 + $0x1c8] sm:$0xff]  ;;  %v1450_v13 = vld [vmem:[#allocation5 + $0x140] sm:$0xff]  ;;  %v146_v16 = vld.sshfl [vmem:[#allocation1 + $0x20] sm:$0xff pattern:$0x73625140] }
  0x32   :  { %701 = vmatpush.bf16.msra.mxu1 %v1419_v31  ;;  %v1458_v14 = vld [vmem:[#allocation5 + $0x180] sm:$0xff]  ;;  %v148_v18 = vld.sshfl [vmem:[#allocation1 + $0x30] sm:$0xff pattern:$0x73625140]  ;;  %v162_v20 = vpack.c.bf16 %v146_v16, %v146_v16  ;;  %v1481_v24 = vld [vmem:[#allocation7 + $0x38] sm:$0xff] }
  0x33   :  { %714 = vmatpush.bf16.msra.mxu2 %v1427_v32  ;;  %v1466_v15 = vld [vmem:[#allocation5 + $0x1c0] sm:$0xff]  ;;  %v149_v19 = vld.sshfl [vmem:[#allocation1 + $0x38] sm:$0xff pattern:$0x73625140]  ;;  %v164_v22 = vpack.c.bf16 %v148_v18, %v148_v18  ;;  %v1479_v26 = vld [vmem:[#allocation7 + $0x28] sm:$0xff] }
  0x34   :  { %727 = vmatpush.bf16.msra.mxu3 %v1435_v33  ;;  %v147_v17 = vld.sshfl [vmem:[#allocation1 + $0x28] sm:$0xff pattern:$0x73625140]  ;;  %v165_v23 = vpack.c.bf16 %v149_v19, %v149_v19  ;;  %v1480_v25 = vld [vmem:[#allocation7 + $0x30] sm:$0xff]  ;;  %v1477_v28 = vld [vmem:[#allocation7 + $0x18] sm:$0xff] }
  0x35   :  { %689 = vmatpush.bf16.msra.mxu0 %v1410_v35  ;;  %v163_v21 = vpack.c.bf16 %v147_v17, %v147_v17  ;;  %v1478_v27 = vld [vmem:[#allocation7 + $0x20] sm:$0xff]  ;;  %v1476_v30 = vld [vmem:[#allocation7 + $0x10] sm:$0xff]  ;;  %v1475_v32 = vld [vmem:[#allocation7 + $0x8] sm:$0xff] }
  0x36   :  { %702 = vmatpush.bf16.msra.mxu1 %v1418_v37  ;;  %v1474_v36 = vld [vmem:[#allocation7] sm:$0xff]  ;;  %v1487_v44 = vld [vmem:[#allocation8 + $0x28] sm:$0xff]  ;;  %v1512_v17 = vld [vmem:[%s1776_s6] ss:$0 sm:$0xff] }
  0x37   :  { %715 = vmatpush.bf16.msra.mxu2 %v1426_v38  ;;  %v1510_v38 = vld [vmem:[%s1772_s2] ss:$0 sm:$0xff]  ;;  %v1490_v16 = vld [vmem:[#allocation10] sm:$0xff] }
  0x38   :  { %728 = vmatpush.bf16.msra.mxu3 %v1434_v39  ;;  %690 = vmatmul.bf16.vlgmr.msra.gmra.mxu0 %v158_v49  ;;  %v1489_v39 = vld [vmem:[#allocation8 + $0x38] sm:$0xff] }
  0x39   :  { %734 = vmatpush.bf16.msrb.mxu0 %v1449_v40  ;;  %703 = vmatmul.bf16.vlgmr.msra.gmra.mxu1 %v159_v51 }
  0x3a   :  { %747 = vmatpush.bf16.msrb.mxu1 %v1457_v42  ;;  %716 = vmatmul.bf16.vlgmr.msra.gmra.mxu2 %v160_v48  ;;  %v1488_v42 = vld [vmem:[#allocation8 + $0x30] sm:$0xff]  ;;  %v1485_v48 = vld [vmem:[#allocation8 + $0x18] sm:$0xff] }
  0x3b   :  { %760 = vmatpush.bf16.msrb.mxu2 %v1465_v46  ;;  %729 = vmatmul.bf16.vlgmr.msra.gmra.mxu3 %v161_v50  ;;  %v1486_v46 = vld [vmem:[#allocation8 + $0x20] sm:$0xff] }
  0x3c   :  { %773 = vmatpush.bf16.msrb.mxu3 %v1473_v47 }
  0x3d   :  { %735 = vmatpush.bf16.msrb.mxu0 %v1448_v52 }
  0x3e   :  { %748 = vmatpush.bf16.msrb.mxu1 %v1456_v53  ;;  %v1484_v53 = vld [vmem:[#allocation8 + $0x10] sm:$0xff] }
  0x3f   :  { %761 = vmatpush.bf16.msrb.mxu2 %v1464_v54 }
  0x40   :  { %774 = vmatpush.bf16.msrb.mxu3 %v1472_v55 }
  0x41   :  { %736 = vmatpush.bf16.msrb.mxu0 %v1447_v56 }
  0x42   :  { %749 = vmatpush.bf16.msrb.mxu1 %v1455_v57 }
  0x43   :  { %762 = vmatpush.bf16.msrb.mxu2 %v1463_v58 }
  0x44   :  { %775 = vmatpush.bf16.msrb.mxu3 %v1471_v59 }
  0x45   :  { %737 = vmatpush.bf16.msrb.mxu0 %v1446_v60 }
  0x46   :  { %750 = vmatpush.bf16.msrb.mxu1 %v1454_v61 }
  0x47   :  { %763 = vmatpush.bf16.msrb.mxu2 %v1462_v62 }
  0x48   :  { %776 = vmatpush.bf16.msrb.mxu3 %v1470_v63 }
  0x49   :  { %738 = vmatpush.bf16.msrb.mxu0 %v1445_v0 }
  0x4a   :  { %751 = vmatpush.bf16.msrb.mxu1 %v1453_v1  ;;  %v1483_v1 = vld [vmem:[#allocation8 + $0x8] sm:$0xff] }
  0x4b   :  { %764 = vmatpush.bf16.msrb.mxu2 %v1461_v2  ;;  %v1482_v2 = vld [vmem:[#allocation8] sm:$0xff] }
  0x4c   :  { %777 = vmatpush.bf16.msrb.mxu3 %v1469_v3  ;;  %v1497_v3 = vld [vmem:[#allocation10 + $0x38] sm:$0xff] }
  0x4d   :  { %739 = vmatpush.bf16.msrb.mxu0 %v1444_v4  ;;  %v1496_v4 = vld [vmem:[#allocation10 + $0x30] sm:$0xff] }
  0x4e   :  { %752 = vmatpush.bf16.msrb.mxu1 %v1452_v5  ;;  %v1495_v5 = vld [vmem:[#allocation10 + $0x28] sm:$0xff] }
  0x4f   :  { %765 = vmatpush.bf16.msrb.mxu2 %v1460_v6  ;;  %v1494_v6 = vld [vmem:[#allocation10 + $0x20] sm:$0xff] }
  0x50   :  { %778 = vmatpush.bf16.msrb.mxu3 %v1468_v7  ;;  %v1493_v7 = vld [vmem:[#allocation10 + $0x18] sm:$0xff] }
  0x51   :  { %740 = vmatpush.bf16.msrb.mxu0 %v1443_v8  ;;  %v1492_v8 = vld [vmem:[#allocation10 + $0x10] sm:$0xff] }
  0x52   :  { %753 = vmatpush.bf16.msrb.mxu1 %v1451_v9  ;;  %v1511_v9 = vld [vmem:[%s1774_s4] ss:$0 sm:$0xff] }
  0x53   :  { %766 = vmatpush.bf16.msrb.mxu2 %v1459_v10 }
  0x54   :  { %779 = vmatpush.bf16.msrb.mxu3 %v1467_v11 }
  0x55   :  { %741 = vmatpush.bf16.msrb.mxu0 %v1442_v12 }
  0x56   :  { %754 = vmatpush.bf16.msrb.mxu1 %v1450_v13 }
  0x57   :  { %767 = vmatpush.bf16.msrb.mxu2 %v1458_v14 }
  0x58   :  { %780 = vmatpush.bf16.msrb.mxu3 %v1466_v15  ;;  %742 = vmatmul.bf16.vlgmr.msrb.gmra.mxu0 %v162_v20  ;;  %v1491_v15 = vld [vmem:[#allocation10 + $0x8] sm:$0xff] }
  0x59   :  { %755 = vmatmul.bf16.vlgmr.msrb.gmra.mxu1 %v163_v21  ;;  %856 = vmatpush.bf16.msra.mxu0 %v1481_v24 }
  0x5a   :  { %768 = vmatmul.bf16.vlgmr.msrb.gmra.mxu2 %v164_v22  ;;  %939 = vmatpush.bf16.msra.mxu1 %v1489_v39 }
  0x5b   :  { %781 = vmatmul.bf16.vlgmr.msrb.gmra.mxu3 %v165_v23  ;;  %1022 = vmatpush.bf16.msra.mxu2 %v1497_v3  ;;  %v1513_v23 = vld [vmem:[%s1778_s8] ss:$0 sm:$0xff] }
  0x5d   :  { %857 = vmatpush.bf16.msra.mxu0 %v1480_v25 }
  0x5e   :  { %940 = vmatpush.bf16.msra.mxu1 %v1488_v42 }
  0x5f   :  { %1023 = vmatpush.bf16.msra.mxu2 %v1496_v4 }
  0x61   :  { %858 = vmatpush.bf16.msra.mxu0 %v1479_v26 }
  0x62   :  { %941 = vmatpush.bf16.msra.mxu1 %v1487_v44 }
  0x63   :  { %1024 = vmatpush.bf16.msra.mxu2 %v1495_v5 }
  0x65   :  { %859 = vmatpush.bf16.msra.mxu0 %v1478_v27 }
  0x66   :  { %942 = vmatpush.bf16.msra.mxu1 %v1486_v46 }
  0x67   :  { %1025 = vmatpush.bf16.msra.mxu2 %v1494_v6 }
  0x69   :  { %860 = vmatpush.bf16.msra.mxu0 %v1477_v28 }
  0x6a   :  { %943 = vmatpush.bf16.msra.mxu1 %v1485_v48 }
  0x6b   :  { %1026 = vmatpush.bf16.msra.mxu2 %v1493_v7 }
  0x6d   :  { %861 = vmatpush.bf16.msra.mxu0 %v1476_v30 }
  0x6e   :  { %944 = vmatpush.bf16.msra.mxu1 %v1484_v53 }
  0x6f   :  { %1027 = vmatpush.bf16.msra.mxu2 %v1492_v8 }
  0x71   :  { %862 = vmatpush.bf16.msra.mxu0 %v1475_v32 }
  0x72   :  { %945 = vmatpush.bf16.msra.mxu1 %v1483_v1 }
  0x73   :  { %1028 = vmatpush.bf16.msra.mxu2 %v1491_v15 }
  0x75   :  { %863 = vmatpush.bf16.msra.mxu0 %v1474_v36 }
  0x76   :  { %946 = vmatpush.bf16.msra.mxu1 %v1482_v2 }
  0x77   :  { %1029 = vmatpush.bf16.msra.mxu2 %v1490_v16 }
  0xb5   :  { %v691_v29 = vpop.f32.mrf.mxu0 }
  0xb6   :  { %v704_v31 = vpop.f32.mrf.mxu1  ;;  %v692_v43 = vadd.f32 %v1510_v38, %v691_v29 }
  0xb8   :  { %v705_v45 = vadd.f32 %v704_v31, %v692_v43 }
  0xbd   :  { %v717_v33 = vpop.f32.mrf.mxu2  ;;  %v693_v35 = vpop.f32.mrf.mxu0 }
  0xbe   :  { %v730_v34 = vpop.f32.mrf.mxu3  ;;  %v706_v37 = vpop.f32.mrf.mxu1  ;;  %v718_v47 = vadd.f32 %v717_v33, %v705_v45 }
  0xc0   :  { %v731_v49 = vadd.f32 %v730_v34, %v718_v47 }
  0xc5   :  { %v719_v40 = vpop.f32.mrf.mxu2 }
  0xc6   :  { %v732_v41 = vpop.f32.mrf.mxu3 }
  0xd5   :  { %v743_v50 = vpop.f32.mrf.mxu0 }
  0xd6   :  { %v756_v51 = vpop.f32.mrf.mxu1  ;;  %v744_v52 = vadd.f32 %v743_v50, %v731_v49 }
  0xd8   :  { %v757_v54 = vadd.f32 %v756_v51, %v744_v52 }
  0xdd   :  { %v769_v55 = vpop.f32.mrf.mxu2  ;;  %v745_v58 = vpop.f32.mrf.mxu0 }
  0xde   :  { %v782_v56 = vpop.f32.mrf.mxu3  ;;  %v770_v57 = vadd.f32 %v769_v55, %v757_v54  ;;  %v758_v59 = vpop.f32.mrf.mxu1 }
  0xe0   :  { %v783_v60 = vadd.f32 %v782_v56, %v770_v57 }
  0xe2   :  { %v786_v61 = vmax.f32 %v783_v60, 0.0 }
  0xe4   :  { %v787_v62 = vpack.c.bf16 %v786_v61, %v786_v61 }
  0xe5   :  { %v771_v63 = vpop.f32.mrf.mxu2 }
  0xe6   :  { %v784_v0 = vpop.f32.mrf.mxu3  ;;  %864 = vmatmul.bf16.vlgmr.msra.gmra.mxu0 %v787_v62 }
 0x163   :  { %v865_v10 = vpop.f32.mrf.mxu0 }
 0x164   :  { %v866_v11 = vadd.f32 %v1511_v9, %v865_v10 }
 0x166   :  { %v869_v12 = vmax.f32 %v866_v11, 0.0 }
 0x168   :  { %v870_v13 = vpack.c.bf16 %v869_v12, %v869_v12 }
 0x16a   :  { %947 = vmatmul.bf16.vlgmr.msra.gmra.mxu1 %v870_v13 }
 0x16b   :  { %v867_v14 = vpop.f32.mrf.mxu0 }
 0x1e7   :  { %v948_v18 = vpop.f32.mrf.mxu1 }
 0x1e8   :  { %v949_v19 = vadd.f32 %v1512_v17, %v948_v18 }
 0x1ea   :  { %v952_v20 = vmax.f32 %v949_v19, 0.0 }
 0x1ec   :  { %v953_v21 = vpack.c.bf16 %v952_v20, %v952_v20 }
 0x1ee   :  { %1030 = vmatmul.bf16.vlgmr.msra.gmra.mxu2 %v953_v21 }
 0x1ef   :  { %v950_v22 = vpop.f32.mrf.mxu1 }
 0x271   :  { %v1031_v24 = vpop.f32.mrf.mxu2 }
 0x272   :  { %v1032_v25 = vadd.f32 %v1513_v23, %v1031_v24 }
 0x274   :  { %v1035_v26 = vmax.f32 %v1032_v25, 0.0 }
 0x276   :  { %1036 = vst [vmem:[#allocation11] sm:$0xff] %v1035_v26 }
 0x279   :  { %v1033_v27 = vpop.f32.mrf.mxu2 }
 0x27a   :  { %1040 = vsyncadd [#allocation4], 96  ;;  %s1043_s6 = sshll.u32 %s1779_s9, 4  ;;  %s1675_s20 = smov [#allocation11]   ;;  %s1044_s6 = int_to_ptr.hbm [resolvable:$true] %s1043_s6 }
 0x27b   :  { %s1041_s21 = sshll.u32 %s1675_s20, 4  ;;  %s1676_s1 = smov 32   ;;  %s1042_s21 = int_to_ptr.vmem [resolvable:$true] %s1041_s21 }
 0x27c   :  { %s1677_s22 = smov 2  }
 0x27d   :  { %1049 = dma.vmem_to_hbm [thread:$0]  %s1042_s21, 32, %s1044_s6, [#allocation4], %s1676_s1, %s1676_s1, %s1677_s22  }
 0x27e   :  { %1664 = dma.done.wait [#allocation4], 128  }
 0x27f   :  { %1665 = vsyncadd [#allocation4], 4294967168 }
 0x280   :  { %1054 = vsyncpa [#allocation3], 1 }
 0x281   :  { %1055 = vsyncpa [#allocation6], 1 }
 0x282   :  { %1056 = vsyncpa [#allocation9], 1 }
 0x283   :  { %1057 = vsyncpa [#allocation4], 1 }

</bundles_post_ra>
